<compile_context>
chip_gen: v5e
topology: v5e:2x2
jax: 0.10.0
libtpu: 0.0.40
codegen_flags: <defaults>
</compile_context>

<pallas_src>
import jax
import jax.numpy as jnp
from jax.experimental import pallas as pl
from jax.experimental.pallas import tpu as pltpu


# ---------------------------------------------------------------------------
# Utilities: per-generation VMEM budget, padding, tile selection.
# ---------------------------------------------------------------------------
def _vmem_capacity_bytes():
    try:
        return int(pltpu.get_tpu_info().vmem_capacity_bytes)
    except Exception:
        return 64 << 20  # conservative fallback (v7x per-TensorCore VMEM)


def _vmem_limit_bytes():
    # Generous but safe scoped-VMEM limit: v5e default is only 16 MiB, so set
    # it explicitly; never exceed 75% of physical (v7x = 64 MiB).
    return min(48 << 20, int(0.75 * _vmem_capacity_bytes()))


def _round_up(n, m):
    return ((n + m - 1) // m) * m


def _pick_tile(n_pad, cap):
    """Largest multiple-of-256 divisor of n_pad that is <= cap."""
    t = min(cap, n_pad)
    t -= t % 256
    while t >= 256:
        if n_pad % t == 0:
            return t
        t -= 256
    return 256


# ---------------------------------------------------------------------------
# Path A: fully fused 2-layer forward (single launch, grid=(1,), f32).
# ---------------------------------------------------------------------------
def fused_gat_kernel(adj_ref, x_ref, w1_ref, w2_ref, o_ref):
    """out = relu(A @ relu(A @ (X @ W1)) @ W2), everything VMEM-resident."""
    adj = adj_ref[...]
    xw1 = jnp.dot(x_ref[...], w1_ref[...], preferred_element_type=jnp.float32)
    h = jnp.maximum(jnp.dot(adj, xw1, preferred_element_type=jnp.float32), 0.0)
    hw2 = jnp.dot(h, w2_ref[...], preferred_element_type=jnp.float32)
    out = jnp.maximum(jnp.dot(adj, hw2, preferred_element_type=jnp.float32), 0.0)
    o_ref[...] = out.astype(o_ref.dtype)


def gat_fused(adj, x, w1, w2):
    n = adj.shape[0]
    f_in = x.shape[1]
    d_h = w1.shape[1]
    n_cls = w2.shape[1]
    return pl.pallas_call(
        fused_gat_kernel,
        out_shape=jax.ShapeDtypeStruct((n, n_cls), jnp.float32),
        grid_spec=pltpu.PrefetchScalarGridSpec(
            num_scalar_prefetch=0,
            grid=(1,),
            in_specs=[
                pl.BlockSpec((n, n), lambda i: (0, 0)),        # adjacency
                pl.BlockSpec((n, f_in), lambda i: (0, 0)),     # features
                pl.BlockSpec((f_in, d_h), lambda i: (0, 0)),   # W1
                pl.BlockSpec((d_h, n_cls), lambda i: (0, 0)),  # W2
            ],
            out_specs=pl.BlockSpec((n, n_cls), lambda i: (0, 0)),
        ),
        compiler_params=pltpu.CompilerParams(
            dimension_semantics=("arbitrary",),
            vmem_limit_bytes=_vmem_limit_bytes()),
    )(adj, x, w1, w2)


# ---------------------------------------------------------------------------
# Path B: scalable tiled path (bf16 operands, f32 accumulation).
# ---------------------------------------------------------------------------
def xw_kernel(x_ref, w_ref, o_ref):
    """Row-tiled feature transform: o = x_tile @ W (computed ONCE)."""
    o_ref[...] = jnp.dot(
        x_ref[...], w_ref[...], preferred_element_type=jnp.float32
    ).astype(o_ref.dtype)


def feature_transform(x, w, *, tile_m, out_dtype=jnp.bfloat16):
    n, f_in = x.shape
    f_out = w.shape[1]
    assert n % tile_m == 0
    return pl.pallas_call(
        xw_kernel,
        out_shape=jax.ShapeDtypeStruct((n, f_out), out_dtype),
        grid_spec=pltpu.PrefetchScalarGridSpec(
            num_scalar_prefetch=0,
            grid=(n // tile_m,),
            in_specs=[
                pl.BlockSpec((tile_m, f_in), lambda i: (i, 0)),
                pl.BlockSpec((f_in, f_out), lambda i: (0, 0)),
            ],
            out_specs=pl.BlockSpec((tile_m, f_out), lambda i: (i, 0)),
        ),
        compiler_params=pltpu.CompilerParams(
            dimension_semantics=("parallel",),
            vmem_limit_bytes=_vmem_limit_bytes()),
    )(x, w)


def agg_relu_w2_kernel(adj_ref, xw_ref, w2_ref, o_ref, acc_ref):
    """acc += adj_tile @ xw[k-slice];  finalize: o = relu(acc) @ W2.

    xw_ref and w2_ref are fully VMEM-resident (constant index maps) and are
    sliced in-kernel, so they are DMA'd from HBM exactly once.
    """
    k = pl.program_id(1)
    tile_k = adj_ref.shape[1]

    @pl.when(k == 0)
    def _init():
        acc_ref[...] = jnp.zeros_like(acc_ref)

    start = pl.multiple_of(k * tile_k, tile_k)
    acc_ref[...] += jnp.dot(adj_ref[...], xw_ref[pl.ds(start, tile_k), :],
                            preferred_element_type=jnp.float32)

    @pl.when(k == pl.num_programs(1) - 1)
    def _finalize():
        h = jnp.maximum(acc_ref[...], 0.0)
        o_ref[...] = jnp.dot(h, w2_ref[...],
                             preferred_element_type=jnp.float32
                             ).astype(o_ref.dtype)


def aggregate_relu_then_w2(adj, xw, w2, *, tile_m, tile_k,
                           out_dtype=jnp.bfloat16):
    n = adj.shape[0]
    d_h = xw.shape[1]
    n_out = w2.shape[1]
    assert n % tile_m == 0 and n % tile_k == 0
    return pl.pallas_call(
        agg_relu_w2_kernel,
        out_shape=jax.ShapeDtypeStruct((n, n_out), out_dtype),
        grid_spec=pltpu.PrefetchScalarGridSpec(
            num_scalar_prefetch=0,
            grid=(n // tile_m, n // tile_k),
            in_specs=[
                pl.BlockSpec((tile_m, tile_k), lambda i, k: (i, k)),  # adj tile
                pl.BlockSpec((n, d_h), lambda i, k: (0, 0)),          # XW resident
                pl.BlockSpec((d_h, n_out), lambda i, k: (0, 0)),      # W2 resident
            ],
            out_specs=pl.BlockSpec((tile_m, n_out), lambda i, k: (i, 0)),
            scratch_shapes=[pltpu.VMEM((tile_m, d_h), jnp.float32)],
        ),
        compiler_params=pltpu.CompilerParams(
            dimension_semantics=("parallel", "arbitrary"),
            vmem_limit_bytes=_vmem_limit_bytes()),
    )(adj, xw, w2)


def agg_relu_kernel(adj_ref, xw_ref, o_ref):
    """o_tile = relu(sum_k adj[i,k] @ xw[k]); accumulates directly in o_ref."""
    k = pl.program_id(1)
    tile_k = adj_ref.shape[1]

    @pl.when(k == 0)
    def _init():
        o_ref[...] = jnp.zeros_like(o_ref)

    start = pl.multiple_of(k * tile_k, tile_k)
    o_ref[...] += jnp.dot(adj_ref[...], xw_ref[pl.ds(start, tile_k), :],
                          preferred_element_type=jnp.float32)

    @pl.when(k == pl.num_programs(1) - 1)
    def _finalize():
        o_ref[...] = jnp.maximum(o_ref[...], 0.0)


def aggregate_relu(adj, xw, *, tile_m, tile_k):
    n = adj.shape[0]
    f_out = xw.shape[1]
    assert n % tile_m == 0 and n % tile_k == 0
    return pl.pallas_call(
        agg_relu_kernel,
        out_shape=jax.ShapeDtypeStruct((n, f_out), jnp.float32),
        grid_spec=pltpu.PrefetchScalarGridSpec(
            num_scalar_prefetch=0,
            grid=(n // tile_m, n // tile_k),
            in_specs=[
                pl.BlockSpec((tile_m, tile_k), lambda i, k: (i, k)),  # adj tile
                pl.BlockSpec((n, f_out), lambda i, k: (0, 0)),        # resident
            ],
            out_specs=pl.BlockSpec((tile_m, f_out), lambda i, k: (i, 0)),
        ),
        compiler_params=pltpu.CompilerParams(
            dimension_semantics=("parallel", "arbitrary"),
            vmem_limit_bytes=_vmem_limit_bytes()),
    )(adj, xw)


# ---------------------------------------------------------------------------
# Glue: dense normalized adjacency + forward dispatcher.
# ---------------------------------------------------------------------------
def build_normalized_adjacency(edge_index, num_nodes):
    """Dense D^{-1/2}(A + I)D^{-1/2}, matching PyG GCNConv normalization."""
    src = edge_index[0]
    dst = edge_index[1]
    adj = jnp.zeros((num_nodes, num_nodes), jnp.float32)
    # message flows src -> dst, aggregated at dst  =>  A[dst, src] = 1
    adj = adj.at[dst, src].add(1.0)
    adj = adj + jnp.eye(num_nodes, dtype=jnp.float32)   # add_self_loops
    deg = adj.sum(axis=1)
    dinv = jnp.where(deg > 0, 1.0 / jnp.sqrt(deg), 0.0)
    return dinv[:, None] * adj * dinv[None, :]


def gat_forward(x, edge_index, w1, w2, *, a_hat=None, fused=None,
                tile_m=256, tile_k_cap=8192):
    """GAT.forward (2 GCNConv layers, bias=False, relu activations, eval mode)."""
    n = x.shape[0]
    d_h = w1.shape[1]
    n_cls = w2.shape[1]
    if a_hat is None:
        # TODO(synk): in the transductive/cached setting precompute a_hat once
        # outside the hot loop (several N^2 HBM passes of plain XLA otherwise).
        a_hat = build_normalized_adjacency(edge_index, n)

    if fused is None:
        # Count inputs + output (x2 for double buffering) + in-kernel
        # intermediates (xw1, h, hw2) with margin against the scoped budget.
        base = 4 * (n * n + x.size + w1.size + w2.size + n * n_cls)
        inter = 4 * (2 * n * d_h + 2 * n * n_cls)
        fused = (2 * base + inter) <= int(0.8 * _vmem_limit_bytes())

    if fused:
        out = gat_fused(a_hat, x, w1, w2)
    else:
        # ---- Path B: zero-pad N to a tile multiple; bf16 operand streams ----
        n_pad = _round_up(n, 256)
        if n_pad != n:
            pad = n_pad - n
            a_hat = jnp.pad(a_hat, ((0, pad), (0, pad)))
            x = jnp.pad(x, ((0, pad), (0, 0)))
        tile_m = _pick_tile(n_pad, tile_m)
        tile_k = _pick_tile(n_pad, tile_k_cap)
        tile_ft = _pick_tile(n_pad, 1024)

        adj_bf = a_hat.astype(jnp.bfloat16)          # halves the N^2 stream
        # layer 0: dropout(identity in eval) -> X@W1 (once, row-tiled)
        xw1 = feature_transform(x, w1, tile_m=tile_ft)
        # layer 0 aggregation + relu, with layer-1 feature transform fused
        # into the finalize step (no HBM round trip of the hidden H).
        hw2 = aggregate_relu_then_w2(adj_bf, xw1, w2,
                                     tile_m=tile_m, tile_k=tile_k)
        # layer 1: aggregation + relu (accumulates directly into the output)
        out = aggregate_relu(adj_bf, hw2, tile_m=tile_m, tile_k=tile_k)[:n]
    return jnp.squeeze(out)   # torch.squeeze(x)


def reference_forward(x, edge_index, w1, w2):
    """Pure-JAX f32 reference for correctness checking."""
    a_hat = build_normalized_adjacency(edge_index, x.shape[0])
    h = jnp.maximum(a_hat @ (x @ w1), 0.0)
    out = jnp.maximum(a_hat @ (h @ w2), 0.0)
    return jnp.squeeze(out)


if __name__ == "__main__":
    def glorot(k, shape):
        limit = jnp.sqrt(6.0 / (shape[0] + shape[1]))
        return jax.random.uniform(k, shape, jnp.float32, -limit, limit)

    key = jax.random.PRNGKey(0)
    kx, ke, kw1, kw2, kx2, ke2, kw3, kw4 = jax.random.split(key, 8)

    # ---- test 1: small graph -> fully fused single-launch f32 path ----------
    N, NUM_FEATS, DIM_HIDDEN, NUM_CLASSES, NUM_EDGES = 128, 64, 32, 16, 256
    x = jax.random.normal(kx, (N, NUM_FEATS), jnp.float32)
    e = jax.random.randint(ke, (2, NUM_EDGES), 0, N, jnp.int32)
    edge_index = jnp.concatenate([e, e[::-1]], axis=1)   # undirected
    w1 = glorot(kw1, (NUM_FEATS, DIM_HIDDEN))
    w2 = glorot(kw2, (DIM_HIDDEN, NUM_CLASSES))

    out = jax.block_until_ready(gat_forward(x, edge_index, w1, w2))
    ref = reference_forward(x, edge_index, w1, w2)
    assert out.shape == (N, NUM_CLASSES), out.shape
    assert jnp.allclose(out, ref, atol=1e-4, rtol=1e-4), "fused path mismatch"

    # ---- test 2: larger, non-multiple-of-256 graph -> tiled bf16 path -------
    N2, F2, H2, C2, E2 = 300, 128, 64, 16, 1024
    x2 = jax.random.normal(kx2, (N2, F2), jnp.float32)
    e2 = jax.random.randint(ke2, (2, E2), 0, N2, jnp.int32)
    edge_index2 = jnp.concatenate([e2, e2[::-1]], axis=1)
    w3 = glorot(kw3, (F2, H2))
    w4 = glorot(kw4, (H2, C2))

    a_hat2 = build_normalized_adjacency(edge_index2, N2)  # cached (transductive)
    out2 = jax.block_until_ready(
        gat_forward(x2, edge_index2, w3, w4, a_hat=a_hat2, fused=False))
    ref2 = reference_forward(x2, edge_index2, w3, w4)
    assert out2.shape == (N2, C2), out2.shape
    # bf16 adjacency / operand streams with f32 accumulation -> relaxed tol.
    assert jnp.allclose(out2, ref2, atol=5e-2, rtol=5e-2), "tiled path mismatch"

    print("KERNEL_OK")
</pallas_src>

<mosaic_0001>
module attributes {stable_mosaic.version = 11 : i64} {
  func.func @fused_gat_kernel(%arg0: i32, %arg1: memref<128x128xf32, #tpu.memory_space<vmem>>, %arg2: memref<128x64xf32, #tpu.memory_space<vmem>>, %arg3: memref<64x32xf32, #tpu.memory_space<vmem>>, %arg4: memref<32x16xf32, #tpu.memory_space<vmem>>, %arg5: memref<128x16xf32, #tpu.memory_space<vmem>>) attributes {dimension_semantics = [#tpu.dimension_semantics<arbitrary>], iteration_bounds = array<i64: 1>, scalar_prefetch = 0 : i64, scratch_operands = 0 : i64, tpu.core_type = #tpu.core_type<tc>, window_params = [{pipeline_mode = #tpu.pipeline_mode<synchronous>, transform_indices = @transform_0, window_bounds = array<i64: 128, 128>}, {pipeline_mode = #tpu.pipeline_mode<synchronous>, transform_indices = @transform_1, window_bounds = array<i64: 128, 64>}, {pipeline_mode = #tpu.pipeline_mode<synchronous>, transform_indices = @transform_2, window_bounds = array<i64: 64, 32>}, {pipeline_mode = #tpu.pipeline_mode<synchronous>, transform_indices = @transform_3, window_bounds = array<i64: 32, 16>}, {pipeline_mode = #tpu.pipeline_mode<synchronous>, transform_indices = @transform_4, window_bounds = array<i64: 128, 16>}]} {
    %c0 = arith.constant 0 : index
    %c0_0 = arith.constant 0 : index
    %0 = vector.load %arg1[%c0, %c0_0] : memref<128x128xf32, #tpu.memory_space<vmem>>, vector<128x128xf32>
    %c0_1 = arith.constant 0 : index
    %c0_2 = arith.constant 0 : index
    %1 = vector.load %arg2[%c0_1, %c0_2] : memref<128x64xf32, #tpu.memory_space<vmem>>, vector<128x64xf32>
    %c0_3 = arith.constant 0 : index
    %c0_4 = arith.constant 0 : index
    %2 = vector.load %arg3[%c0_3, %c0_4] : memref<64x32xf32, #tpu.memory_space<vmem>>, vector<64x32xf32>
    %cst = arith.constant dense<0.000000e+00> : vector<128x32xf32>
    %3 = tpu.matmul %1, %2, %cst {dimension_numbers = #tpu.dot_dimension_numbers<[1], [0], [0], [1], [0, 0, 1, 1], [], []>} : vector<128x64xf32>, vector<64x32xf32>, vector<128x32xf32> -> vector<128x32xf32>
    %cst_5 = arith.constant dense<0.000000e+00> : vector<128x32xf32>
    %4 = tpu.matmul %0, %3, %cst_5 {dimension_numbers = #tpu.dot_dimension_numbers<[1], [0], [0], [1], [0, 0, 1, 1], [], []>} : vector<128x128xf32>, vector<128x32xf32>, vector<128x32xf32> -> vector<128x32xf32>
    %cst_6 = arith.constant 0.000000e+00 : f32
    %5 = vector.broadcast %cst_6 : f32 to vector<128x32xf32>
    %6 = arith.maximumf %4, %5 : vector<128x32xf32>
    %c0_7 = arith.constant 0 : index
    %c0_8 = arith.constant 0 : index
    %7 = vector.load %arg4[%c0_7, %c0_8] : memref<32x16xf32, #tpu.memory_space<vmem>>, vector<32x16xf32>
    %cst_9 = arith.constant dense<0.000000e+00> : vector<128x16xf32>
    %8 = tpu.matmul %6, %7, %cst_9 {dimension_numbers = #tpu.dot_dimension_numbers<[1], [0], [0], [1], [0, 0, 1, 1], [], []>} : vector<128x32xf32>, vector<32x16xf32>, vector<128x16xf32> -> vector<128x16xf32>
    %cst_10 = arith.constant dense<0.000000e+00> : vector<128x16xf32>
    %9 = tpu.matmul %0, %8, %cst_10 {dimension_numbers = #tpu.dot_dimension_numbers<[1], [0], [0], [1], [0, 0, 1, 1], [], []>} : vector<128x128xf32>, vector<128x16xf32>, vector<128x16xf32> -> vector<128x16xf32>
    %cst_11 = arith.constant 0.000000e+00 : f32
    %10 = vector.broadcast %cst_11 : f32 to vector<128x16xf32>
    %11 = arith.maximumf %9, %10 : vector<128x16xf32>
    %c0_12 = arith.constant 0 : index
    %c0_13 = arith.constant 0 : index
    %12 = vector.load %arg5[%c0_12, %c0_13] : memref<128x16xf32, #tpu.memory_space<vmem>>, vector<128x16xf32>
    tpu.vector_store %arg5[%c0_12, %c0_13], %11 {strides = array<i32>} : memref<128x16xf32, #tpu.memory_space<vmem>>, vector<128x16xf32>,
    return
  }
  func.func @transform_0(%arg0: i32) -> (i32, i32) {
    %c0_i32 = arith.constant 0 : i32
    %c0_i32_0 = arith.constant 0 : i32
    %c0_i32_1 = arith.constant 0 : i32
    return %c0_i32, %c0_i32_0 : i32, i32
  }
  func.func @transform_1(%arg0: i32) -> (i32, i32) {
    %c0_i32 = arith.constant 0 : i32
    %c0_i32_0 = arith.constant 0 : i32
    %c0_i32_1 = arith.constant 0 : i32
    return %c0_i32, %c0_i32_0 : i32, i32
  }
  func.func @transform_2(%arg0: i32) -> (i32, i32) {
    %c0_i32 = arith.constant 0 : i32
    %c0_i32_0 = arith.constant 0 : i32
    %c0_i32_1 = arith.constant 0 : i32
    return %c0_i32, %c0_i32_0 : i32, i32
  }
  func.func @transform_3(%arg0: i32) -> (i32, i32) {
    %c0_i32 = arith.constant 0 : i32
    %c0_i32_0 = arith.constant 0 : i32
    %c0_i32_1 = arith.constant 0 : i32
    return %c0_i32, %c0_i32_0 : i32, i32
  }
  func.func @transform_4(%arg0: i32) -> (i32, i32) {
    %c0_i32 = arith.constant 0 : i32
    %c0_i32_0 = arith.constant 0 : i32
    %c0_i32_1 = arith.constant 0 : i32
    return %c0_i32, %c0_i32_0 : i32, i32
  }
}

</mosaic_0001>

<bundles_post_ra>
// kernel: tpu_custom_call.1
= control target key start
LH: loop header
LB: loop body
LE: loop exit
PB: predicated region body
PF: predicated region fallthrough
CT: control target
= control target key end

     0   :  { %vm57_vm0 = vcmask 523264   ;;  %vm256_vm1 = vcmask 261120   ;;  %vm451_vm2 = vcmask 130048   ;;  %s821_s2 = inlined_call_operand.vmem [shape: f32[64,32], index: 2, kind: input, shape index: {}]   ;;  %s822_s1 = inlined_call_operand.vmem [shape: f32[128,64], index: 1, kind: input, shape index: {}]   ;;  %s823_s0 = inlined_call_operand.vmem [shape: f32[128,128], index: 0, kind: input, shape index: {}]   ;;  %s824_s3 = inlined_call_operand.vmem [shape: f32[32,16], index: 3, kind: input, shape index: {}]   ;;  %s825_s4 = inlined_call_operand.vmem [shape: f32[128,16], index: 4, kind: output, shape index: {}]  }
   0x1   :  { %v56_v0 = vld [vmem:[%s821_s2 + $0x38] sm:$0xff]  ;;  %v55_v1 = vld [vmem:[%s821_s2 + $0x30] sm:$0xff]  ;;  %v54_v2 = vld [vmem:[%s821_s2 + $0x28] sm:$0xff] }
   0x2   :  { %114 = vmatpush.msra.mxu0 %v56_v0  ;;  %v53_v3 = vld [vmem:[%s821_s2 + $0x20] sm:$0xff]  ;;  %v52_v4 = vld [vmem:[%s821_s2 + $0x18] sm:$0xff]  ;;  %v51_v5 = vld [vmem:[%s821_s2 + $0x10] sm:$0xff] }
   0x3   :  { %v50_v6 = vld [vmem:[%s821_s2 + $0x8] sm:$0xff]  ;;  %v49_v7 = vld [vmem:[%s821_s2] sm:$0xff]  ;;  %v35_v10 = vld [vmem:[%s822_s1 + $0x10] sm:$0xff] }
   0x4   :  { %115 = vmatpush.msra.mxu0 %v55_v1  ;;  %v33_v8 = vld [vmem:[%s822_s1] sm:$0xff]  ;;  %v34_v9 = vld [vmem:[%s822_s1 + $0x8] sm:$0xff]  ;;  %v36_v11 = vld [vmem:[%s822_s1 + $0x18] sm:$0xff] }
   0x5   :  { %v37_v12 = vld [vmem:[%s822_s1 + $0x20] sm:$0xff]  ;;  %v38_v13 = vld [vmem:[%s822_s1 + $0x28] sm:$0xff]  ;;  %v39_v14 = vld [vmem:[%s822_s1 + $0x30] sm:$0xff] }
   0x6   :  { %116 = vmatpush.msra.mxu0 %v54_v2  ;;  %v40_v15 = vld [vmem:[%s822_s1 + $0x38] sm:$0xff]  ;;  %v41_v16 = vld [vmem:[%s822_s1 + $0x40] sm:$0xff]  ;;  %v42_v17 = vld [vmem:[%s822_s1 + $0x48] sm:$0xff] }
   0x7   :  { %v43_v18 = vld [vmem:[%s822_s1 + $0x50] sm:$0xff]  ;;  %v44_v19 = vld [vmem:[%s822_s1 + $0x58] sm:$0xff]  ;;  %v45_v20 = vld [vmem:[%s822_s1 + $0x60] sm:$0xff] }
   0x8   :  { %117 = vmatpush.msra.mxu0 %v53_v3  ;;  %v46_v21 = vld [vmem:[%s822_s1 + $0x68] sm:$0xff]  ;;  %v47_v22 = vld [vmem:[%s822_s1 + $0x70] sm:$0xff]  ;;  %v48_v23 = vld [vmem:[%s822_s1 + $0x78] sm:$0xff] }
   0x9   :  { %v620_v40 = vld [vmem:[%s823_s0] sm:$0xff]  ;;  %v626_v41 = vld [vmem:[%s823_s0 + $0x8] sm:$0xff]  ;;  %v632_v42 = vld [vmem:[%s823_s0 + $0x10] sm:$0xff] }
   0xa   :  { %118 = vmatpush.msra.mxu0 %v52_v4  ;;  %v638_v43 = vld [vmem:[%s823_s0 + $0x18] sm:$0xff]  ;;  %v644_v44 = vld [vmem:[%s823_s0 + $0x20] sm:$0xff]  ;;  %v650_v45 = vld [vmem:[%s823_s0 + $0x28] sm:$0xff] }
   0xb   :  { %v656_v46 = vld [vmem:[%s823_s0 + $0x30] sm:$0xff]  ;;  %v662_v47 = vld [vmem:[%s823_s0 + $0x38] sm:$0xff]  ;;  %v668_v48 = vld [vmem:[%s823_s0 + $0x40] sm:$0xff] }
   0xc   :  { %119 = vmatpush.msra.mxu0 %v51_v5  ;;  %v674_v49 = vld [vmem:[%s823_s0 + $0x48] sm:$0xff]  ;;  %v680_v50 = vld [vmem:[%s823_s0 + $0x50] sm:$0xff]  ;;  %v686_v51 = vld [vmem:[%s823_s0 + $0x58] sm:$0xff] }
   0xd   :  { %v255_v52 = vld [vmem:[%s824_s3 + $0x18] sm:$0xff]  ;;  %v254_v53 = vld [vmem:[%s824_s3 + $0x10] sm:$0xff]  ;;  %v253_v54 = vld [vmem:[%s824_s3 + $0x8] sm:$0xff] }
   0xe   :  { %120 = vmatpush.msra.mxu0 %v50_v6  ;;  %317 = vmatpush.msra.mxu2 %v255_v52  ;;  %v701_v55 = vld [vmem:[%s823_s0 + $0x60] sm:$0xff]  ;;  %v710_v57 = vld [vmem:[%s823_s0 + $0x68] sm:$0xff]  ;;  %v716_v58 = vld [vmem:[%s823_s0 + $0x70] sm:$0xff] }
   0xf   :  { %v252_v56 = vld [vmem:[%s824_s3] sm:$0xff]  ;;  %v722_v59 = vld [vmem:[%s823_s0 + $0x78] sm:$0xff] }
  0x10   :  { %121 = vmatpush.msra.mxu0 %v49_v7  ;;  %318 = vmatpush.msra.mxu2 %v254_v53 }
  0x11   :  { %472 = vmatmul.msk.f32.vlgmr.msra.gmra.mxu0 %vm57_vm0, %v33_v8 }
  0x12   :  { %319 = vmatpush.msra.mxu2 %v253_v54 }
  0x14   :  { %320 = vmatpush.msra.mxu2 %v252_v56 }
  0x19   :  { %473 = vmatmul.msk.f32.gmra.mxu0 %vm57_vm0, %v34_v9 }
  0x21   :  { %474 = vmatmul.msk.f32.gmra.mxu0 %vm57_vm0, %v35_v10 }
  0x29   :  { %475 = vmatmul.msk.f32.gmra.mxu0 %vm57_vm0, %v36_v11 }
  0x31   :  { %476 = vmatmul.msk.f32.gmra.mxu0 %vm57_vm0, %v37_v12 }
  0x39   :  { %477 = vmatmul.msk.f32.gmra.mxu0 %vm57_vm0, %v38_v13 }
  0x41   :  { %478 = vmatmul.msk.f32.gmra.mxu0 %vm57_vm0, %v39_v14 }
  0x49   :  { %479 = vmatmul.msk.f32.gmra.mxu0 %vm57_vm0, %v40_v15 }
  0x51   :  { %480 = vmatmul.msk.f32.gmra.mxu0 %vm57_vm0, %v41_v16 }
  0x59   :  { %481 = vmatmul.msk.f32.gmra.mxu0 %vm57_vm0, %v42_v17 }
  0x61   :  { %482 = vmatmul.msk.f32.gmra.mxu0 %vm57_vm0, %v43_v18 }
  0x69   :  { %483 = vmatmul.msk.f32.gmra.mxu0 %vm57_vm0, %v44_v19 }
  0x71   :  { %484 = vmatmul.msk.f32.gmra.mxu0 %vm57_vm0, %v45_v20 }
  0x79   :  { %485 = vmatmul.msk.f32.gmra.mxu0 %vm57_vm0, %v46_v21 }
  0x81   :  { %486 = vmatmul.msk.f32.gmra.mxu0 %vm57_vm0, %v47_v22 }
  0x89   :  { %487 = vmatmul.msk.f32.gmra.mxu0 %vm57_vm0, %v48_v23 }
  0x8e   :  { %v123_v24 = vpop.f32.mrf.mxu0 }
  0x96   :  { %v126_v25 = vpop.f32.mrf.mxu0 }
  0x9e   :  { %v129_v26 = vpop.f32.mrf.mxu0 }
  0xa6   :  { %v132_v27 = vpop.f32.mrf.mxu0 }
  0xae   :  { %v135_v28 = vpop.f32.mrf.mxu0 }
  0xb6   :  { %v138_v29 = vpop.f32.mrf.mxu0 }
  0xbe   :  { %v141_v30 = vpop.f32.mrf.mxu0 }
  0xc6   :  { %v144_v31 = vpop.f32.mrf.mxu0 }
  0xce   :  { %v147_v32 = vpop.f32.mrf.mxu0 }
  0xd6   :  { %v150_v33 = vpop.f32.mrf.mxu0 }
  0xde   :  { %v153_v34 = vpop.f32.mrf.mxu0 }
  0xe6   :  { %v156_v35 = vpop.f32.mrf.mxu0 }
  0xee   :  { %v159_v36 = vpop.f32.mrf.mxu0 }
  0xf6   :  { %v162_v37 = vpop.f32.mrf.mxu0 }
  0xfe   :  { %v165_v38 = vpop.f32.mrf.mxu0 }
 0x106   :  { %v168_v39 = vpop.f32.mrf.mxu0 }
 0x107   :  { %171 = vmatpush.msra.mxu1 %v168_v39 }
 0x109   :  { %172 = vmatpush.msra.mxu1 %v165_v38 }
 0x10b   :  { %173 = vmatpush.msra.mxu1 %v162_v37 }
 0x10d   :  { %174 = vmatpush.msra.mxu1 %v159_v36 }
 0x10f   :  { %175 = vmatpush.msra.mxu1 %v156_v35 }
 0x111   :  { %176 = vmatpush.msra.mxu1 %v153_v34 }
 0x113   :  { %177 = vmatpush.msra.mxu1 %v150_v33 }
 0x115   :  { %178 = vmatpush.msra.mxu1 %v147_v32 }
 0x117   :  { %179 = vmatpush.msra.mxu1 %v144_v31 }
 0x119   :  { %180 = vmatpush.msra.mxu1 %v141_v30 }
 0x11b   :  { %181 = vmatpush.msra.mxu1 %v138_v29 }
 0x11d   :  { %182 = vmatpush.msra.mxu1 %v135_v28 }
 0x11f   :  { %183 = vmatpush.msra.mxu1 %v132_v27 }
 0x121   :  { %184 = vmatpush.msra.mxu1 %v129_v26 }
 0x123   :  { %185 = vmatpush.msra.mxu1 %v126_v25 }
 0x125   :  { %186 = vmatpush.msra.mxu1 %v123_v24 }
 0x126   :  { %187 = vmatmul.f32.vlgmr.msra.gmra.mxu1 %v620_v40 }
 0x12e   :  { %190 = vmatmul.f32.gmra.mxu1 %v626_v41 }
 0x136   :  { %193 = vmatmul.f32.gmra.mxu1 %v632_v42 }
 0x13e   :  { %196 = vmatmul.f32.gmra.mxu1 %v638_v43 }
 0x146   :  { %199 = vmatmul.f32.gmra.mxu1 %v644_v44 }
 0x14e   :  { %202 = vmatmul.f32.gmra.mxu1 %v650_v45 }
 0x156   :  { %205 = vmatmul.f32.gmra.mxu1 %v656_v46 }
 0x15e   :  { %208 = vmatmul.f32.gmra.mxu1 %v662_v47 }
 0x166   :  { %211 = vmatmul.f32.gmra.mxu1 %v668_v48 }
 0x16e   :  { %214 = vmatmul.f32.gmra.mxu1 %v674_v49 }
 0x176   :  { %217 = vmatmul.f32.gmra.mxu1 %v680_v50 }
 0x17e   :  { %220 = vmatmul.f32.gmra.mxu1 %v686_v51 }
 0x186   :  { %223 = vmatmul.f32.gmra.mxu1 %v701_v55 }
 0x18e   :  { %226 = vmatmul.f32.gmra.mxu1 %v710_v57 }
 0x196   :  { %229 = vmatmul.f32.gmra.mxu1 %v716_v58 }
 0x19e   :  { %232 = vmatmul.f32.gmra.mxu1 %v722_v59 }
 0x1a3   :  { %v188_v60 = vpop.f32.mrf.mxu1 }
 0x1a4   :  { %v236_v61 = vmax.f32 %v188_v60, 0.0 }
 0x1a6   :  { %488 = vmatmul.msk.f32.vlgmr.msra.gmra.mxu2 %vm256_vm1, %v236_v61 }
 0x1ab   :  { %v191_v62 = vpop.f32.mrf.mxu1 }
 0x1ac   :  { %v237_v63 = vmax.f32 %v191_v62, 0.0 }
 0x1ae   :  { %489 = vmatmul.msk.f32.gmra.mxu2 %vm256_vm1, %v237_v63 }
 0x1b3   :  { %v194_v0 = vpop.f32.mrf.mxu1 }
 0x1b4   :  { %v238_v1 = vmax.f32 %v194_v0, 0.0 }
 0x1b6   :  { %490 = vmatmul.msk.f32.gmra.mxu2 %vm256_vm1, %v238_v1 }
 0x1bb   :  { %v197_v2 = vpop.f32.mrf.mxu1 }
 0x1bc   :  { %v239_v3 = vmax.f32 %v197_v2, 0.0 }
 0x1be   :  { %491 = vmatmul.msk.f32.gmra.mxu2 %vm256_vm1, %v239_v3 }
 0x1c3   :  { %v200_v4 = vpop.f32.mrf.mxu1 }
 0x1c4   :  { %v240_v5 = vmax.f32 %v200_v4, 0.0 }
 0x1c6   :  { %492 = vmatmul.msk.f32.gmra.mxu2 %vm256_vm1, %v240_v5 }
 0x1cb   :  { %v203_v6 = vpop.f32.mrf.mxu1 }
 0x1cc   :  { %v241_v7 = vmax.f32 %v203_v6, 0.0 }
 0x1ce   :  { %493 = vmatmul.msk.f32.gmra.mxu2 %vm256_vm1, %v241_v7 }
 0x1d3   :  { %v206_v8 = vpop.f32.mrf.mxu1 }
 0x1d4   :  { %v242_v9 = vmax.f32 %v206_v8, 0.0 }
 0x1d6   :  { %494 = vmatmul.msk.f32.gmra.mxu2 %vm256_vm1, %v242_v9 }
 0x1db   :  { %v209_v10 = vpop.f32.mrf.mxu1 }
 0x1dc   :  { %v243_v11 = vmax.f32 %v209_v10, 0.0 }
 0x1de   :  { %495 = vmatmul.msk.f32.gmra.mxu2 %vm256_vm1, %v243_v11 }
 0x1e3   :  { %v212_v12 = vpop.f32.mrf.mxu1 }
 0x1e4   :  { %v244_v13 = vmax.f32 %v212_v12, 0.0 }
 0x1e6   :  { %496 = vmatmul.msk.f32.gmra.mxu2 %vm256_vm1, %v244_v13 }
 0x1eb   :  { %v215_v14 = vpop.f32.mrf.mxu1 }
 0x1ec   :  { %v245_v15 = vmax.f32 %v215_v14, 0.0 }
 0x1ee   :  { %497 = vmatmul.msk.f32.gmra.mxu2 %vm256_vm1, %v245_v15 }
 0x1f3   :  { %v218_v16 = vpop.f32.mrf.mxu1 }
 0x1f4   :  { %v246_v17 = vmax.f32 %v218_v16, 0.0 }
 0x1f6   :  { %498 = vmatmul.msk.f32.gmra.mxu2 %vm256_vm1, %v246_v17 }
 0x1fb   :  { %v221_v18 = vpop.f32.mrf.mxu1 }
 0x1fc   :  { %v247_v19 = vmax.f32 %v221_v18, 0.0 }
 0x1fe   :  { %499 = vmatmul.msk.f32.gmra.mxu2 %vm256_vm1, %v247_v19 }
 0x203   :  { %v224_v20 = vpop.f32.mrf.mxu1 }
 0x204   :  { %v248_v21 = vmax.f32 %v224_v20, 0.0 }
 0x206   :  { %500 = vmatmul.msk.f32.gmra.mxu2 %vm256_vm1, %v248_v21 }
 0x20b   :  { %v227_v22 = vpop.f32.mrf.mxu1 }
 0x20c   :  { %v249_v23 = vmax.f32 %v227_v22, 0.0 }
 0x20e   :  { %501 = vmatmul.msk.f32.gmra.mxu2 %vm256_vm1, %v249_v23 }
 0x213   :  { %v230_v24 = vpop.f32.mrf.mxu1 }
 0x214   :  { %v250_v25 = vmax.f32 %v230_v24, 0.0 }
 0x216   :  { %502 = vmatmul.msk.f32.gmra.mxu2 %vm256_vm1, %v250_v25 }
 0x21b   :  { %v233_v26 = vpop.f32.mrf.mxu1 }
 0x21c   :  { %v251_v27 = vmax.f32 %v233_v26, 0.0 }
 0x21e   :  { %503 = vmatmul.msk.f32.gmra.mxu2 %vm256_vm1, %v251_v27 }
 0x229   :  { %v322_v28 = vpop.f32.mrf.mxu2 }
 0x231   :  { %v325_v29 = vpop.f32.mrf.mxu2 }
 0x239   :  { %v328_v30 = vpop.f32.mrf.mxu2 }
 0x241   :  { %v331_v31 = vpop.f32.mrf.mxu2 }
 0x249   :  { %v334_v32 = vpop.f32.mrf.mxu2 }
 0x251   :  { %v337_v33 = vpop.f32.mrf.mxu2 }
 0x259   :  { %v340_v34 = vpop.f32.mrf.mxu2 }
 0x261   :  { %v343_v35 = vpop.f32.mrf.mxu2 }
 0x269   :  { %v346_v36 = vpop.f32.mrf.mxu2 }
 0x271   :  { %v349_v37 = vpop.f32.mrf.mxu2 }
 0x279   :  { %v352_v38 = vpop.f32.mrf.mxu2 }
 0x281   :  { %v355_v39 = vpop.f32.mrf.mxu2 }
 0x289   :  { %v358_v52 = vpop.f32.mrf.mxu2 }
 0x291   :  { %v361_v53 = vpop.f32.mrf.mxu2 }
 0x299   :  { %v364_v54 = vpop.f32.mrf.mxu2 }
 0x2a1   :  { %v367_v56 = vpop.f32.mrf.mxu2 }
 0x2a2   :  { %370 = vmatpush.msra.mxu3 %v367_v56 }
 0x2a4   :  { %371 = vmatpush.msra.mxu3 %v364_v54 }
 0x2a6   :  { %372 = vmatpush.msra.mxu3 %v361_v53 }
 0x2a8   :  { %373 = vmatpush.msra.mxu3 %v358_v52 }
 0x2aa   :  { %374 = vmatpush.msra.mxu3 %v355_v39 }
 0x2ac   :  { %375 = vmatpush.msra.mxu3 %v352_v38 }
 0x2ae   :  { %376 = vmatpush.msra.mxu3 %v349_v37 }
 0x2b0   :  { %377 = vmatpush.msra.mxu3 %v346_v36 }
 0x2b2   :  { %378 = vmatpush.msra.mxu3 %v343_v35 }
 0x2b4   :  { %379 = vmatpush.msra.mxu3 %v340_v34 }
 0x2b6   :  { %380 = vmatpush.msra.mxu3 %v337_v33 }
 0x2b8   :  { %381 = vmatpush.msra.mxu3 %v334_v32 }
 0x2ba   :  { %382 = vmatpush.msra.mxu3 %v331_v31 }
 0x2bc   :  { %383 = vmatpush.msra.mxu3 %v328_v30 }
 0x2be   :  { %384 = vmatpush.msra.mxu3 %v325_v29 }
 0x2c0   :  { %385 = vmatpush.msra.mxu3 %v322_v28 }
 0x2c1   :  { %386 = vmatmul.f32.vlgmr.msra.gmra.mxu3 %v620_v40 }
 0x2c9   :  { %389 = vmatmul.f32.gmra.mxu3 %v626_v41 }
 0x2d1   :  { %392 = vmatmul.f32.gmra.mxu3 %v632_v42 }
 0x2d9   :  { %395 = vmatmul.f32.gmra.mxu3 %v638_v43 }
 0x2e1   :  { %398 = vmatmul.f32.gmra.mxu3 %v644_v44 }
 0x2e9   :  { %401 = vmatmul.f32.gmra.mxu3 %v650_v45 }
 0x2f1   :  { %404 = vmatmul.f32.gmra.mxu3 %v656_v46 }
 0x2f9   :  { %407 = vmatmul.f32.gmra.mxu3 %v662_v47 }
 0x301   :  { %410 = vmatmul.f32.gmra.mxu3 %v668_v48 }
 0x309   :  { %413 = vmatmul.f32.gmra.mxu3 %v674_v49 }
 0x311   :  { %416 = vmatmul.f32.gmra.mxu3 %v680_v50 }
 0x319   :  { %419 = vmatmul.f32.gmra.mxu3 %v686_v51 }
 0x321   :  { %422 = vmatmul.f32.gmra.mxu3 %v701_v55 }
 0x329   :  { %425 = vmatmul.f32.gmra.mxu3 %v710_v57 }
 0x331   :  { %428 = vmatmul.f32.gmra.mxu3 %v716_v58 }
 0x339   :  { %431 = vmatmul.f32.gmra.mxu3 %v722_v59 }
 0x344   :  { %v387_v40 = vpop.f32.mrf.mxu3 }
 0x345   :  { %v435_v41 = vmax.f32 %v387_v40, 0.0 }
 0x347   :  { %452 = vst.msk [vmem:[%s825_s4] sm:$0xff] %vm451_vm2, %v435_v41 }
 0x34c   :  { %v390_v42 = vpop.f32.mrf.mxu3 }
 0x34d   :  { %v436_v43 = vmax.f32 %v390_v42, 0.0 }
 0x34f   :  { %453 = vst.msk [vmem:[%s825_s4 + $0x8] sm:$0xff] %vm451_vm2, %v436_v43 }
 0x354   :  { %v393_v44 = vpop.f32.mrf.mxu3 }
 0x355   :  { %v437_v45 = vmax.f32 %v393_v44, 0.0 }
 0x357   :  { %454 = vst.msk [vmem:[%s825_s4 + $0x10] sm:$0xff] %vm451_vm2, %v437_v45 }
 0x35c   :  { %v396_v46 = vpop.f32.mrf.mxu3 }
 0x35d   :  { %v438_v47 = vmax.f32 %v396_v46, 0.0 }
 0x35f   :  { %455 = vst.msk [vmem:[%s825_s4 + $0x18] sm:$0xff] %vm451_vm2, %v438_v47 }
 0x364   :  { %v399_v48 = vpop.f32.mrf.mxu3 }
 0x365   :  { %v439_v49 = vmax.f32 %v399_v48, 0.0 }
 0x367   :  { %456 = vst.msk [vmem:[%s825_s4 + $0x20] sm:$0xff] %vm451_vm2, %v439_v49 }
 0x36c   :  { %v402_v50 = vpop.f32.mrf.mxu3 }
 0x36d   :  { %v440_v51 = vmax.f32 %v402_v50, 0.0 }
 0x36f   :  { %457 = vst.msk [vmem:[%s825_s4 + $0x28] sm:$0xff] %vm451_vm2, %v440_v51 }
 0x374   :  { %v405_v55 = vpop.f32.mrf.mxu3 }
 0x375   :  { %v441_v57 = vmax.f32 %v405_v55, 0.0 }
 0x377   :  { %458 = vst.msk [vmem:[%s825_s4 + $0x30] sm:$0xff] %vm451_vm2, %v441_v57 }
 0x37c   :  { %v408_v58 = vpop.f32.mrf.mxu3 }
 0x37d   :  { %v442_v59 = vmax.f32 %v408_v58, 0.0 }
 0x37f   :  { %459 = vst.msk [vmem:[%s825_s4 + $0x38] sm:$0xff] %vm451_vm2, %v442_v59 }
 0x384   :  { %v411_v60 = vpop.f32.mrf.mxu3 }
 0x385   :  { %v443_v61 = vmax.f32 %v411_v60, 0.0 }
 0x387   :  { %460 = vst.msk [vmem:[%s825_s4 + $0x40] sm:$0xff] %vm451_vm2, %v443_v61 }
 0x38c   :  { %v414_v62 = vpop.f32.mrf.mxu3 }
 0x38d   :  { %v444_v63 = vmax.f32 %v414_v62, 0.0 }
 0x38f   :  { %461 = vst.msk [vmem:[%s825_s4 + $0x48] sm:$0xff] %vm451_vm2, %v444_v63 }
 0x394   :  { %v417_v0 = vpop.f32.mrf.mxu3 }
 0x395   :  { %v445_v1 = vmax.f32 %v417_v0, 0.0 }
 0x397   :  { %462 = vst.msk [vmem:[%s825_s4 + $0x50] sm:$0xff] %vm451_vm2, %v445_v1 }
 0x39c   :  { %v420_v2 = vpop.f32.mrf.mxu3 }
 0x39d   :  { %v446_v3 = vmax.f32 %v420_v2, 0.0 }
 0x39f   :  { %463 = vst.msk [vmem:[%s825_s4 + $0x58] sm:$0xff] %vm451_vm2, %v446_v3 }
 0x3a4   :  { %v423_v4 = vpop.f32.mrf.mxu3 }
 0x3a5   :  { %v447_v5 = vmax.f32 %v423_v4, 0.0 }
 0x3a7   :  { %464 = vst.msk [vmem:[%s825_s4 + $0x60] sm:$0xff] %vm451_vm2, %v447_v5 }
 0x3ac   :  { %v426_v6 = vpop.f32.mrf.mxu3 }
 0x3ad   :  { %v448_v7 = vmax.f32 %v426_v6, 0.0 }
 0x3af   :  { %465 = vst.msk [vmem:[%s825_s4 + $0x68] sm:$0xff] %vm451_vm2, %v448_v7 }
 0x3b4   :  { %v429_v8 = vpop.f32.mrf.mxu3 }
 0x3b5   :  { %v449_v9 = vmax.f32 %v429_v8, 0.0 }
 0x3b7   :  { %466 = vst.msk [vmem:[%s825_s4 + $0x70] sm:$0xff] %vm451_vm2, %v449_v9 }
 0x3bc   :  { %v432_v10 = vpop.f32.mrf.mxu3 }
 0x3bd   :  { %v450_v11 = vmax.f32 %v432_v10, 0.0 }
 0x3bf   :  { %467 = vst.msk [vmem:[%s825_s4 + $0x78] sm:$0xff] %vm451_vm2, %v450_v11 }

</bundles_post_ra>
